<compile_context>
chip_gen: v5e
topology: v5e:2x2
jax: 0.10.0
libtpu: 0.0.40
codegen_flags: <defaults>
</compile_context>

<pallas_src>
import functools

import jax
import jax.numpy as jnp
import numpy as np
from jax.experimental import pallas as pl
from jax.experimental.pallas import tpu as pltpu


# ------------------------------ Pallas kernel ------------------------------ #

def _decoder_block_kernel(x0_ref, x_ref, upmap_ref, hmask_ref,
                          w1t_ref, b1_ref, hwt_ref, vwt_ref, dwb_ref,
                          cwt_ref, cb_ref, m1_ref, m2t_ref, w2t_ref, b2_ref,
                          out_ref, *, cin, w2, ktaps):
    """One batch element per grid step; everything channels-major (C, H*W)."""
    f32 = jnp.float32
    x0 = x0_ref[0]                       # (Cin, S2)  skip connection (full res)
    xl = x_ref[0]                        # (Cin, S)   low-res feature
    s2 = x0.shape[1]
    c2 = w1t_ref.shape[0]
    pad = ktaps // 2
    padl = pad * w2                      # flat-lane padding (covers both axes)

    # --- fused bilinear x2 upsample (align_corners=True): one matmul --------
    up = jnp.dot(xl, upmap_ref[...], preferred_element_type=f32)    # (Cin, S2)

    # --- PointwiseConv #1: channel concat folded into a split weight --------
    w1t = w1t_ref[...]                                              # (C2, C2)
    y = (jnp.dot(w1t[:, :cin], x0, preferred_element_type=f32)
         + jnp.dot(w1t[:, cin:], up, preferred_element_type=f32)
         + b1_ref[...])
    y = jnp.maximum(y, 0.0)                                         # (C2, S2)

    # --- AxialDepthwiseConv on the flat lane axis ----------------------------
    zpad = jnp.zeros((c2, padl), f32)
    ypad = jnp.concatenate([zpad, y, zpad], axis=1)     # (C2, S2 + 2*padl)
    hwt = hwt_ref[...]                                  # (C2, K)
    vwt = vwt_ref[...]                                  # (C2, K)
    hmask = hmask_ref[...]                              # (K, S2) 0/1 row mask
    h_acc = None
    v_acc = None
    for k in range(ktaps):
        off = k - pad
        if off == 0:
            th = y * hwt[:, k:k + 1]
            tv = y * vwt[:, k:k + 1]
        else:
            # horizontal: shift along W == shift of the flat axis by `off`,
            # masked where the shift would bleed across a row boundary.
            sh = ypad[:, padl + off: padl + off + s2]
            th = (sh * hmask[k:k + 1, :]) * hwt[:, k:k + 1]
            # vertical: shift along H == shift of the flat axis by off*W;
            # the zero padding already supplies the boundary zeros.
            sv = ypad[:, padl + off * w2: padl + off * w2 + s2]
            tv = sv * vwt[:, k:k + 1]
        h_acc = th if h_acc is None else h_acc + th
        v_acc = tv if v_acc is None else v_acc + tv
    # dwb = horizontal bias + vertical bias (pre-summed on host); + residual y
    x2 = h_acc + v_acc + y + dwb_ref[...]

    # --- 1x1 conv to out_channels --------------------------------------------
    a = jnp.maximum(x2, 0.0)
    z = jnp.dot(cwt_ref[...], a, preferred_element_type=f32) + cb_ref[...]  # (Cout, S2)

    # --- CALayer: global avg pool + 2-layer MLP + sigmoid gate (VPU/XLU, not
    #     MXU: the dots here have M=1 and would be pure MXU latency) ---------
    avg = jnp.mean(z, axis=1, keepdims=True)                               # (Cout, 1)
    hid = jnp.maximum(jnp.sum(avg * m1_ref[...], axis=0, keepdims=True), 0.0)   # (1, Cred)
    gate = jax.nn.sigmoid(jnp.sum(m2t_ref[...] * hid, axis=1, keepdims=True))   # (Cout, 1)

    # --- relu -> PointwiseConv #2 -> relu (outer DecoderBlock relu dropped:
    #     idempotent after the inner one) ------------------------------------
    zr = jnp.maximum(z * gate, 0.0)
    o = jnp.maximum(
        jnp.dot(w2t_ref[...], zr, preferred_element_type=f32) + b2_ref[...], 0.0)
    out_ref[0] = o                                      # lane-dense (Cout, S2) store


# ----------------------------- host-side helpers ---------------------------- #

def _interp_matrix(n_in, n_out):
    """PyTorch bilinear align_corners=True interpolation matrix (n_out, n_in)."""
    if n_in == 1:
        return np.ones((n_out, 1), np.float32)
    src = np.arange(n_out, dtype=np.float64) * (n_in - 1) / (n_out - 1)
    lo = np.floor(src).astype(np.int64)
    hi = np.minimum(lo + 1, n_in - 1)
    frac = (src - lo).astype(np.float32)
    M = np.zeros((n_out, n_in), np.float32)
    M[np.arange(n_out), lo] += 1.0 - frac
    M[np.arange(n_out), hi] += frac
    return M


@jax.jit
def decoder_block_forward(x0, x, params):
    """x0: (B, Cin, 2H, 2W), x: (B, Cin, H, W) NCHW, like the PyTorch module."""
    B, Cin, H, W = x.shape
    H2, W2 = x0.shape[2], x0.shape[3]
    S, S2 = H * W, H2 * W2
    Cout = params["cw"].shape[1]
    K = params["hw"].shape[0]
    pad = K // 2

    # Trace-time constants: separable interp matrices fused into one spatial
    # map, plus the horizontal row-boundary masks for the depthwise taps.
    Mh = _interp_matrix(H, H2)
    Mw = _interp_matrix(W, W2)
    upmap = jnp.asarray(np.kron(Mh, Mw).T)                  # (S, S2)
    w_idx = np.arange(S2) % W2
    hmask = jnp.asarray(np.stack(
        [((w_idx + (k - pad) >= 0) & (w_idx + (k - pad) < W2)).astype(np.float32)
         for k in range(K)], axis=0))                       # (K, S2)

    # Channels-major operands (free reshapes of NCHW) and transposed weights.
    x0_f = x0.reshape(B, Cin, S2)
    x_f = x.reshape(B, Cin, S)
    w1t = params["pw1_w"].T                 # (C2, C2)   rows = out ch, cols = [skip | up]
    b1 = params["pw1_b"].T                  # (C2, 1)
    hwt = params["hw"].T                    # (C2, K)
    vwt = params["vw"].T                    # (C2, K)
    dwb = (params["hb"] + params["vb"]).T   # (C2, 1)   combined depthwise bias
    cwt = params["cw"].T                    # (Cout, C2)
    cb = params["cb"].T                     # (Cout, 1)
    m1 = params["m1"]                       # (Cout, Cred)
    m2t = params["m2"].T                    # (Cout, Cred)
    w2t = params["pw2_w"].T                 # (Cout, Cout)
    b2 = params["pw2_b"].T                  # (Cout, 1)

    full = lambda a: pl.BlockSpec(a.shape, lambda b: (0,) * a.ndim)
    in_specs = [
        pl.BlockSpec((1, Cin, S2), lambda b: (b, 0, 0)),    # x0 (skip)
        pl.BlockSpec((1, Cin, S), lambda b: (b, 0, 0)),     # x (low res)
        full(upmap), full(hmask),
        full(w1t), full(b1), full(hwt), full(vwt), full(dwb),
        full(cwt), full(cb), full(m1), full(m2t), full(w2t), full(b2),
    ]
    out_specs = pl.BlockSpec((1, Cout, S2), lambda b: (b, 0, 0))

    kernel = functools.partial(_decoder_block_kernel, cin=Cin, w2=W2, ktaps=K)
    # TODO(synk): for production resolutions add an H-row grid axis (pad-row
    # halo + carried/two-pass CALayer mean) so tiles fit v7x's 64 MiB VMEM, use
    # separable interp matmuls instead of the kron map, and cast matmul inputs
    # to bf16 on v6e/v7x.
    out_flat = pl.pallas_call(
        kernel,
        out_shape=jax.ShapeDtypeStruct((B, Cout, S2), jnp.float32),
        grid=(B,),
        in_specs=in_specs,
        out_specs=out_specs,
        compiler_params=pltpu.CompilerParams(
            dimension_semantics=("parallel",),
            vmem_limit_bytes=32 * 1024 * 1024),
    )(x0_f, x_f, upmap, hmask, w1t, b1, hwt, vwt, dwb,
      cwt, cb, m1, m2t, w2t, b2)
    return out_flat.reshape(B, Cout, H2, W2)                # NCHW (free reshape)


# ----------------------------- pure-JAX reference --------------------------- #

def reference_forward(x0, x, params):
    B, Cin, H, W = x.shape
    H2, W2 = x0.shape[2], x0.shape[3]
    Mh = jnp.asarray(_interp_matrix(H, H2))
    Mw = jnp.asarray(_interp_matrix(W, W2))
    up = jnp.einsum("oh,pw,bchw->bcop", Mh, Mw, x)
    xc = jnp.concatenate([x0, up], axis=1)                   # (B, C2, H2, W2)
    p = params
    K = p["hw"].shape[0]
    pad = K // 2
    bias = lambda v: v[0][None, :, None, None]               # (1,C) -> (1,C,1,1)

    y = jax.nn.relu(jnp.einsum("bchw,co->bohw", xc, p["pw1_w"]) + bias(p["pw1_b"]))
    yw = jnp.pad(y, ((0, 0), (0, 0), (0, 0), (pad, pad)))
    yh = jnp.pad(y, ((0, 0), (0, 0), (pad, pad), (0, 0)))
    h_out = sum(yw[..., k:k + W2] * p["hw"][k][None, :, None, None]
                for k in range(K)) + bias(p["hb"])
    v_out = sum(yh[:, :, k:k + H2, :] * p["vw"][k][None, :, None, None]
                for k in range(K)) + bias(p["vb"])
    x2 = h_out + v_out + y
    z = jnp.einsum("bchw,co->bohw", jax.nn.relu(x2), p["cw"]) + bias(p["cb"])
    avg = z.mean(axis=(2, 3))                                # (B, Cout)
    gate = jax.nn.sigmoid(jax.nn.relu(avg @ p["m1"]) @ p["m2"])
    zc = z * gate[:, :, None, None]
    o = jax.nn.relu(jnp.einsum("bchw,co->bohw", jax.nn.relu(zc), p["pw2_w"])
                    + bias(p["pw2_b"]))
    return jax.nn.relu(o)                                    # NCHW


# ----------------------------------- main ----------------------------------- #

def init_params(key, in_channels, out_channels, kernel_length=5, reduction=16):
    C2 = 2 * in_channels
    Cout = out_channels
    Cred = max(Cout // reduction, 1)
    ks = jax.random.split(key, 12)
    s = 0.2
    return {
        "pw1_w": s * jax.random.normal(ks[0], (C2, C2), jnp.float32),
        "pw1_b": s * jax.random.normal(ks[1], (1, C2), jnp.float32),
        "hw":    s * jax.random.normal(ks[2], (kernel_length, C2), jnp.float32),
        "hb":    s * jax.random.normal(ks[3], (1, C2), jnp.float32),
        "vw":    s * jax.random.normal(ks[4], (kernel_length, C2), jnp.float32),
        "vb":    s * jax.random.normal(ks[5], (1, C2), jnp.float32),
        "cw":    s * jax.random.normal(ks[6], (C2, Cout), jnp.float32),
        "cb":    s * jax.random.normal(ks[7], (1, Cout), jnp.float32),
        "m1":    s * jax.random.normal(ks[8], (Cout, Cred), jnp.float32),
        "m2":    s * jax.random.normal(ks[9], (Cred, Cout), jnp.float32),
        "pw2_w": s * jax.random.normal(ks[10], (Cout, Cout), jnp.float32),
        "pw2_b": s * jax.random.normal(ks[11], (1, Cout), jnp.float32),
    }
    # NOTE: AxialDepthwiseConv.pointwise_conv is defined but unused in the
    # PyTorch forward, so it contributes no parameters here.


if __name__ == "__main__":
    B, Cin, Cout = 2, 4, 16
    H = W = 8                       # x spatial; x0 is 2H x 2W
    key = jax.random.PRNGKey(0)
    k0, k1, k2 = jax.random.split(key, 3)

    x0 = jax.random.normal(k0, (B, Cin, 2 * H, 2 * W), jnp.float32)  # skip feature
    x = jax.random.normal(k1, (B, Cin, H, W), jnp.float32)           # low-res feature
    params = init_params(k2, Cin, Cout)

    out = jax.block_until_ready(decoder_block_forward(x0, x, params))
    ref = jax.block_until_ready(reference_forward(x0, x, params))
    np.testing.assert_allclose(np.asarray(out), np.asarray(ref), rtol=1e-4, atol=1e-4)

    assert out.shape == (B, Cout, 2 * H, 2 * W)
    print("KERNEL_OK")
</pallas_src>

<mosaic_0001>
module attributes {stable_mosaic.version = 11 : i64} {
  func.func @_decoder_block_kernel(%arg0: i32, %arg1: memref<1x4x256xf32, #tpu.memory_space<vmem>>, %arg2: memref<1x4x64xf32, #tpu.memory_space<vmem>>, %arg3: memref<64x256xf32, #tpu.memory_space<vmem>>, %arg4: memref<5x256xf32, #tpu.memory_space<vmem>>, %arg5: memref<8x8xf32, #tpu.memory_space<vmem>>, %arg6: memref<8x1xf32, #tpu.memory_space<vmem>>, %arg7: memref<8x5xf32, #tpu.memory_space<vmem>>, %arg8: memref<8x5xf32, #tpu.memory_space<vmem>>, %arg9: memref<8x1xf32, #tpu.memory_space<vmem>>, %arg10: memref<16x8xf32, #tpu.memory_space<vmem>>, %arg11: memref<16x1xf32, #tpu.memory_space<vmem>>, %arg12: memref<16x1xf32, #tpu.memory_space<vmem>>, %arg13: memref<16x1xf32, #tpu.memory_space<vmem>>, %arg14: memref<16x16xf32, #tpu.memory_space<vmem>>, %arg15: memref<16x1xf32, #tpu.memory_space<vmem>>, %arg16: memref<1x16x256xf32, #tpu.memory_space<vmem>>) attributes {dimension_semantics = [#tpu.dimension_semantics<parallel>], iteration_bounds = array<i64: 2>, scalar_prefetch = 0 : i64, scratch_operands = 0 : i64, tpu.core_type = #tpu.core_type<tc>, window_params = [{transform_indices = @transform_0, window_bounds = array<i64: 1, 4, 256>}, {transform_indices = @transform_1, window_bounds = array<i64: 1, 4, 64>}, {pipeline_mode = #tpu.pipeline_mode<synchronous>, transform_indices = @transform_2, window_bounds = array<i64: 64, 256>}, {pipeline_mode = #tpu.pipeline_mode<synchronous>, transform_indices = @transform_3, window_bounds = array<i64: 5, 256>}, {pipeline_mode = #tpu.pipeline_mode<synchronous>, transform_indices = @transform_4, window_bounds = array<i64: 8, 8>}, {pipeline_mode = #tpu.pipeline_mode<synchronous>, transform_indices = @transform_5, window_bounds = array<i64: 8, 1>}, {pipeline_mode = #tpu.pipeline_mode<synchronous>, transform_indices = @transform_6, window_bounds = array<i64: 8, 5>}, {pipeline_mode = #tpu.pipeline_mode<synchronous>, transform_indices = @transform_7, window_bounds = array<i64: 8, 5>}, {pipeline_mode = #tpu.pipeline_mode<synchronous>, transform_indices = @transform_8, window_bounds = array<i64: 8, 1>}, {pipeline_mode = #tpu.pipeline_mode<synchronous>, transform_indices = @transform_9, window_bounds = array<i64: 16, 8>}, {pipeline_mode = #tpu.pipeline_mode<synchronous>, transform_indices = @transform_10, window_bounds = array<i64: 16, 1>}, {pipeline_mode = #tpu.pipeline_mode<synchronous>, transform_indices = @transform_11, window_bounds = array<i64: 16, 1>}, {pipeline_mode = #tpu.pipeline_mode<synchronous>, transform_indices = @transform_12, window_bounds = array<i64: 16, 1>}, {pipeline_mode = #tpu.pipeline_mode<synchronous>, transform_indices = @transform_13, window_bounds = array<i64: 16, 16>}, {pipeline_mode = #tpu.pipeline_mode<synchronous>, transform_indices = @transform_14, window_bounds = array<i64: 16, 1>}, {transform_indices = @transform_15, window_bounds = array<i64: 1, 16, 256>}]} {
    %c0 = arith.constant 0 : index
    %c0_0 = arith.constant 0 : index
    %c0_1 = arith.constant 0 : index
    %0 = vector.load %arg1[%c0, %c0_0, %c0_1] : memref<1x4x256xf32, #tpu.memory_space<vmem>>, vector<1x4x256xf32>
    %1 = vector.shape_cast %0 : vector<1x4x256xf32> to vector<4x256xf32>
    %c0_2 = arith.constant 0 : index
    %c0_3 = arith.constant 0 : index
    %c0_4 = arith.constant 0 : index
    %2 = vector.load %arg2[%c0_2, %c0_3, %c0_4] : memref<1x4x64xf32, #tpu.memory_space<vmem>>, vector<1x4x64xf32>
    %3 = vector.shape_cast %2 : vector<1x4x64xf32> to vector<4x64xf32>
    %c0_5 = arith.constant 0 : index
    %c0_6 = arith.constant 0 : index
    %4 = vector.load %arg3[%c0_5, %c0_6] : memref<64x256xf32, #tpu.memory_space<vmem>>, vector<64x256xf32>
    %cst = arith.constant dense<0.000000e+00> : vector<4x256xf32>
    %5 = tpu.matmul %3, %4, %cst {dimension_numbers = #tpu.dot_dimension_numbers<[1], [0], [0], [1], [0, 0, 1, 1], [], []>} : vector<4x64xf32>, vector<64x256xf32>, vector<4x256xf32> -> vector<4x256xf32>
    %c0_7 = arith.constant 0 : index
    %c0_8 = arith.constant 0 : index
    %6 = vector.load %arg5[%c0_7, %c0_8] : memref<8x8xf32, #tpu.memory_space<vmem>>, vector<8x8xf32>
    %7 = vector.extract_strided_slice %6 {offsets = [0, 0], sizes = [8, 4], strides = [1, 1]} : vector<8x8xf32> to vector<8x4xf32>
    %cst_9 = arith.constant dense<0.000000e+00> : vector<8x256xf32>
    %8 = tpu.matmul %7, %1, %cst_9 {dimension_numbers = #tpu.dot_dimension_numbers<[1], [0], [0], [1], [0, 0, 1, 1], [], []>} : vector<8x4xf32>, vector<4x256xf32>, vector<8x256xf32> -> vector<8x256xf32>
    %9 = vector.extract_strided_slice %6 {offsets = [0, 4], sizes = [8, 4], strides = [1, 1]} : vector<8x8xf32> to vector<8x4xf32>
    %cst_10 = arith.constant dense<0.000000e+00> : vector<8x256xf32>
    %10 = tpu.matmul %9, %5, %cst_10 {dimension_numbers = #tpu.dot_dimension_numbers<[1], [0], [0], [1], [0, 0, 1, 1], [], []>} : vector<8x4xf32>, vector<4x256xf32>, vector<8x256xf32> -> vector<8x256xf32>
    %11 = arith.addf %8, %10 : vector<8x256xf32>
    %c0_11 = arith.constant 0 : index
    %c0_12 = arith.constant 0 : index
    %12 = vector.load %arg6[%c0_11, %c0_12] : memref<8x1xf32, #tpu.memory_space<vmem>>, vector<8x1xf32>
    %13 = vector.broadcast %12 : vector<8x1xf32> to vector<8x256xf32>
    %14 = arith.addf %11, %13 : vector<8x256xf32>
    %cst_13 = arith.constant 0.000000e+00 : f32
    %15 = vector.broadcast %cst_13 : f32 to vector<8x256xf32>
    %16 = arith.maximumf %14, %15 : vector<8x256xf32>
    %cst_14 = arith.constant 0.000000e+00 : f32
    %17 = vector.broadcast %cst_14 : f32 to vector<8x32xf32>
    %18 = tpu.concatenate %17, %16, %17 in 1 : vector<8x32xf32>, vector<8x256xf32>, vector<8x32xf32> -> vector<8x320xf32>
    %c0_15 = arith.constant 0 : index
    %c0_16 = arith.constant 0 : index
    %19 = vector.load %arg7[%c0_15, %c0_16] : memref<8x5xf32, #tpu.memory_space<vmem>>, vector<8x5xf32>
    %c0_17 = arith.constant 0 : index
    %c0_18 = arith.constant 0 : index
    %20 = vector.load %arg8[%c0_17, %c0_18] : memref<8x5xf32, #tpu.memory_space<vmem>>, vector<8x5xf32>
    %c0_19 = arith.constant 0 : index
    %c0_20 = arith.constant 0 : index
    %21 = vector.load %arg4[%c0_19, %c0_20] : memref<5x256xf32, #tpu.memory_space<vmem>>, vector<5x256xf32>
    %22 = vector.extract_strided_slice %18 {offsets = [0, 30], sizes = [8, 256], strides = [1, 1]} : vector<8x320xf32> to vector<8x256xf32>
    %23 = vector.extract_strided_slice %21 {offsets = [0, 0], sizes = [1, 256], strides = [1, 1]} : vector<5x256xf32> to vector<1x256xf32>
    %24 = vector.broadcast %23 : vector<1x256xf32> to vector<8x256xf32>
    %25 = arith.mulf %22, %24 : vector<8x256xf32>
    %26 = vector.extract_strided_slice %19 {offsets = [0, 0], sizes = [8, 1], strides = [1, 1]} : vector<8x5xf32> to vector<8x1xf32>
    %27 = vector.broadcast %26 : vector<8x1xf32> to vector<8x256xf32>
    %28 = arith.mulf %25, %27 : vector<8x256xf32>
    %29 = vector.extract_strided_slice %18 {offsets = [0, 0], sizes = [8, 256], strides = [1, 1]} : vector<8x320xf32> to vector<8x256xf32>
    %30 = vector.extract_strided_slice %20 {offsets = [0, 0], sizes = [8, 1], strides = [1, 1]} : vector<8x5xf32> to vector<8x1xf32>
    %31 = vector.broadcast %30 : vector<8x1xf32> to vector<8x256xf32>
    %32 = arith.mulf %29, %31 : vector<8x256xf32>
    %33 = vector.extract_strided_slice %18 {offsets = [0, 31], sizes = [8, 256], strides = [1, 1]} : vector<8x320xf32> to vector<8x256xf32>
    %34 = vector.extract_strided_slice %21 {offsets = [1, 0], sizes = [1, 256], strides = [1, 1]} : vector<5x256xf32> to vector<1x256xf32>
    %35 = vector.broadcast %34 : vector<1x256xf32> to vector<8x256xf32>
    %36 = arith.mulf %33, %35 : vector<8x256xf32>
    %37 = vector.extract_strided_slice %19 {offsets = [0, 1], sizes = [8, 1], strides = [1, 1]} : vector<8x5xf32> to vector<8x1xf32>
    %38 = vector.broadcast %37 : vector<8x1xf32> to vector<8x256xf32>
    %39 = arith.mulf %36, %38 : vector<8x256xf32>
    %40 = vector.extract_strided_slice %18 {offsets = [0, 16], sizes = [8, 256], strides = [1, 1]} : vector<8x320xf32> to vector<8x256xf32>
    %41 = vector.extract_strided_slice %20 {offsets = [0, 1], sizes = [8, 1], strides = [1, 1]} : vector<8x5xf32> to vector<8x1xf32>
    %42 = vector.broadcast %41 : vector<8x1xf32> to vector<8x256xf32>
    %43 = arith.mulf %40, %42 : vector<8x256xf32>
    %44 = arith.addf %28, %39 : vector<8x256xf32>
    %45 = arith.addf %32, %43 : vector<8x256xf32>
    %46 = vector.extract_strided_slice %19 {offsets = [0, 2], sizes = [8, 1], strides = [1, 1]} : vector<8x5xf32> to vector<8x1xf32>
    %47 = vector.broadcast %46 : vector<8x1xf32> to vector<8x256xf32>
    %48 = arith.mulf %16, %47 : vector<8x256xf32>
    %49 = vector.extract_strided_slice %20 {offsets = [0, 2], sizes = [8, 1], strides = [1, 1]} : vector<8x5xf32> to vector<8x1xf32>
    %50 = vector.broadcast %49 : vector<8x1xf32> to vector<8x256xf32>
    %51 = arith.mulf %16, %50 : vector<8x256xf32>
    %52 = arith.addf %44, %48 : vector<8x256xf32>
    %53 = arith.addf %45, %51 : vector<8x256xf32>
    %54 = vector.extract_strided_slice %18 {offsets = [0, 33], sizes = [8, 256], strides = [1, 1]} : vector<8x320xf32> to vector<8x256xf32>
    %55 = vector.extract_strided_slice %21 {offsets = [3, 0], sizes = [1, 256], strides = [1, 1]} : vector<5x256xf32> to vector<1x256xf32>
    %56 = vector.broadcast %55 : vector<1x256xf32> to vector<8x256xf32>
    %57 = arith.mulf %54, %56 : vector<8x256xf32>
    %58 = vector.extract_strided_slice %19 {offsets = [0, 3], sizes = [8, 1], strides = [1, 1]} : vector<8x5xf32> to vector<8x1xf32>
    %59 = vector.broadcast %58 : vector<8x1xf32> to vector<8x256xf32>
    %60 = arith.mulf %57, %59 : vector<8x256xf32>
    %61 = vector.extract_strided_slice %18 {offsets = [0, 48], sizes = [8, 256], strides = [1, 1]} : vector<8x320xf32> to vector<8x256xf32>
    %62 = vector.extract_strided_slice %20 {offsets = [0, 3], sizes = [8, 1], strides = [1, 1]} : vector<8x5xf32> to vector<8x1xf32>
    %63 = vector.broadcast %62 : vector<8x1xf32> to vector<8x256xf32>
    %64 = arith.mulf %61, %63 : vector<8x256xf32>
    %65 = arith.addf %52, %60 : vector<8x256xf32>
    %66 = arith.addf %53, %64 : vector<8x256xf32>
    %67 = vector.extract_strided_slice %18 {offsets = [0, 34], sizes = [8, 256], strides = [1, 1]} : vector<8x320xf32> to vector<8x256xf32>
    %68 = vector.extract_strided_slice %21 {offsets = [4, 0], sizes = [1, 256], strides = [1, 1]} : vector<5x256xf32> to vector<1x256xf32>
    %69 = vector.broadcast %68 : vector<1x256xf32> to vector<8x256xf32>
    %70 = arith.mulf %67, %69 : vector<8x256xf32>
    %71 = vector.extract_strided_slice %19 {offsets = [0, 4], sizes = [8, 1], strides = [1, 1]} : vector<8x5xf32> to vector<8x1xf32>
    %72 = vector.broadcast %71 : vector<8x1xf32> to vector<8x256xf32>
    %73 = arith.mulf %70, %72 : vector<8x256xf32>
    %74 = vector.extract_strided_slice %18 {offsets = [0, 64], sizes = [8, 256], strides = [1, 1]} : vector<8x320xf32> to vector<8x256xf32>
    %75 = vector.extract_strided_slice %20 {offsets = [0, 4], sizes = [8, 1], strides = [1, 1]} : vector<8x5xf32> to vector<8x1xf32>
    %76 = vector.broadcast %75 : vector<8x1xf32> to vector<8x256xf32>
    %77 = arith.mulf %74, %76 : vector<8x256xf32>
    %78 = arith.addf %65, %73 : vector<8x256xf32>
    %79 = arith.addf %66, %77 : vector<8x256xf32>
    %80 = arith.addf %78, %79 : vector<8x256xf32>
    %81 = arith.addf %80, %16 : vector<8x256xf32>
    %c0_21 = arith.constant 0 : index
    %c0_22 = arith.constant 0 : index
    %82 = vector.load %arg9[%c0_21, %c0_22] : memref<8x1xf32, #tpu.memory_space<vmem>>, vector<8x1xf32>
    %83 = vector.broadcast %82 : vector<8x1xf32> to vector<8x256xf32>
    %84 = arith.addf %81, %83 : vector<8x256xf32>
    %cst_23 = arith.constant 0.000000e+00 : f32
    %85 = vector.broadcast %cst_23 : f32 to vector<8x256xf32>
    %86 = arith.maximumf %84, %85 : vector<8x256xf32>
    %c0_24 = arith.constant 0 : index
    %c0_25 = arith.constant 0 : index
    %87 = vector.load %arg10[%c0_24, %c0_25] : memref<16x8xf32, #tpu.memory_space<vmem>>, vector<16x8xf32>
    %cst_26 = arith.constant dense<0.000000e+00> : vector<16x256xf32>
    %88 = tpu.matmul %87, %86, %cst_26 {dimension_numbers = #tpu.dot_dimension_numbers<[1], [0], [0], [1], [0, 0, 1, 1], [], []>} : vector<16x8xf32>, vector<8x256xf32>, vector<16x256xf32> -> vector<16x256xf32>
    %c0_27 = arith.constant 0 : index
    %c0_28 = arith.constant 0 : index
    %89 = vector.load %arg11[%c0_27, %c0_28] : memref<16x1xf32, #tpu.memory_space<vmem>>, vector<16x1xf32>
    %90 = vector.broadcast %89 : vector<16x1xf32> to vector<16x256xf32>
    %91 = arith.addf %88, %90 : vector<16x256xf32>
    %cst_29 = arith.constant dense<0.000000e+00> : vector<16xf32>
    %92 = vector.multi_reduction <add>, %91, %cst_29 [1] : vector<16x256xf32> to vector<16xf32>
    %93 = vector.shape_cast %92 : vector<16xf32> to vector<16x1xf32>
    %cst_30 = arith.constant 2.560000e+02 : f32
    %94 = vector.broadcast %cst_30 : f32 to vector<16x1xf32>
    %95 = arith.divf %93, %94 : vector<16x1xf32>
    %c0_31 = arith.constant 0 : index
    %c0_32 = arith.constant 0 : index
    %96 = vector.load %arg12[%c0_31, %c0_32] : memref<16x1xf32, #tpu.memory_space<vmem>>, vector<16x1xf32>
    %97 = arith.mulf %95, %96 : vector<16x1xf32>
    %cst_33 = arith.constant dense<0.000000e+00> : vector<1xf32>
    %98 = vector.multi_reduction <add>, %97, %cst_33 [0] : vector<16x1xf32> to vector<1xf32>
    %99 = vector.shape_cast %98 : vector<1xf32> to vector<1x1xf32>
    %cst_34 = arith.constant 0.000000e+00 : f32
    %100 = vector.broadcast %cst_34 : f32 to vector<1x1xf32>
    %101 = arith.maximumf %99, %100 : vector<1x1xf32>
    %c0_35 = arith.constant 0 : index
    %c0_36 = arith.constant 0 : index
    %102 = vector.load %arg13[%c0_35, %c0_36] : memref<16x1xf32, #tpu.memory_space<vmem>>, vector<16x1xf32>
    %103 = vector.broadcast %101 : vector<1x1xf32> to vector<16x1xf32>
    %104 = arith.mulf %102, %103 : vector<16x1xf32>
    %cst_37 = arith.constant dense<0.000000e+00> : vector<16xf32>
    %105 = vector.multi_reduction <add>, %104, %cst_37 [1] : vector<16x1xf32> to vector<16xf32>
    %106 = vector.shape_cast %105 : vector<16xf32> to vector<16x1xf32>
    %107 = arith.negf %106 : vector<16x1xf32>
    %108 = math.exp %107 : vector<16x1xf32>
    %cst_38 = arith.constant 1.000000e+00 : f32
    %109 = vector.broadcast %cst_38 : f32 to vector<16x1xf32>
    %110 = arith.addf %109, %108 : vector<16x1xf32>
    %111 = arith.divf %109, %110 : vector<16x1xf32>
    %112 = vector.broadcast %111 : vector<16x1xf32> to vector<16x256xf32>
    %113 = arith.mulf %91, %112 : vector<16x256xf32>
    %cst_39 = arith.constant 0.000000e+00 : f32
    %114 = vector.broadcast %cst_39 : f32 to vector<16x256xf32>
    %115 = arith.maximumf %113, %114 : vector<16x256xf32>
    %c0_40 = arith.constant 0 : index
    %c0_41 = arith.constant 0 : index
    %116 = vector.load %arg14[%c0_40, %c0_41] : memref<16x16xf32, #tpu.memory_space<vmem>>, vector<16x16xf32>
    %cst_42 = arith.constant dense<0.000000e+00> : vector<16x256xf32>
    %117 = tpu.matmul %116, %115, %cst_42 {dimension_numbers = #tpu.dot_dimension_numbers<[1], [0], [0], [1], [0, 0, 1, 1], [], []>} : vector<16x16xf32>, vector<16x256xf32>, vector<16x256xf32> -> vector<16x256xf32>
    %c0_43 = arith.constant 0 : index
    %c0_44 = arith.constant 0 : index
    %118 = vector.load %arg15[%c0_43, %c0_44] : memref<16x1xf32, #tpu.memory_space<vmem>>, vector<16x1xf32>
    %119 = vector.broadcast %118 : vector<16x1xf32> to vector<16x256xf32>
    %120 = arith.addf %117, %119 : vector<16x256xf32>
    %cst_45 = arith.constant 0.000000e+00 : f32
    %121 = vector.broadcast %cst_45 : f32 to vector<16x256xf32>
    %122 = arith.maximumf %120, %121 : vector<16x256xf32>
    %c0_46 = arith.constant 0 : index
    %c0_47 = arith.constant 0 : index
    %c0_48 = arith.constant 0 : index
    %123 = vector.load %arg16[%c0_46, %c0_47, %c0_48] : memref<1x16x256xf32, #tpu.memory_space<vmem>>, vector<1x16x256xf32>
    %124 = vector.shape_cast %123 : vector<1x16x256xf32> to vector<16x256xf32>
    %125 = vector.shape_cast %122 : vector<16x256xf32> to vector<1x16x256xf32>
    tpu.vector_store %arg16[%c0_46, %c0_47, %c0_48], %125 {strides = array<i32>} : memref<1x16x256xf32, #tpu.memory_space<vmem>>, vector<1x16x256xf32>,
    return
  }
  func.func @transform_0(%arg0: i32) -> (i32, i32, i32) {
    %c0_i32 = arith.constant 0 : i32
    %c0_i32_0 = arith.constant 0 : i32
    %c0_i32_1 = arith.constant 0 : i32
    return %arg0, %c0_i32, %c0_i32_0 : i32, i32, i32
  }
  func.func @transform_1(%arg0: i32) -> (i32, i32, i32) {
    %c0_i32 = arith.constant 0 : i32
    %c0_i32_0 = arith.constant 0 : i32
    %c0_i32_1 = arith.constant 0 : i32
    return %arg0, %c0_i32, %c0_i32_0 : i32, i32, i32
  }
  func.func @transform_2(%arg0: i32) -> (i32, i32) {
    %c0_i32 = arith.constant 0 : i32
    %c0_i32_0 = arith.constant 0 : i32
    %c0_i32_1 = arith.constant 0 : i32
    return %c0_i32, %c0_i32_0 : i32, i32
  }
  func.func @transform_3(%arg0: i32) -> (i32, i32) {
    %c0_i32 = arith.constant 0 : i32
    %c0_i32_0 = arith.constant 0 : i32
    %c0_i32_1 = arith.constant 0 : i32
    return %c0_i32, %c0_i32_0 : i32, i32
  }
  func.func @transform_4(%arg0: i32) -> (i32, i32) {
    %c0_i32 = arith.constant 0 : i32
    %c0_i32_0 = arith.constant 0 : i32
    %c0_i32_1 = arith.constant 0 : i32
    return %c0_i32, %c0_i32_0 : i32, i32
  }
  func.func @transform_5(%arg0: i32) -> (i32, i32) {
    %c0_i32 = arith.constant 0 : i32
    %c0_i32_0 = arith.constant 0 : i32
    %c0_i32_1 = arith.constant 0 : i32
    return %c0_i32, %c0_i32_0 : i32, i32
  }
  func.func @transform_6(%arg0: i32) -> (i32, i32) {
    %c0_i32 = arith.constant 0 : i32
    %c0_i32_0 = arith.constant 0 : i32
    %c0_i32_1 = arith.constant 0 : i32
    return %c0_i32, %c0_i32_0 : i32, i32
  }
  func.func @transform_7(%arg0: i32) -> (i32, i32) {
    %c0_i32 = arith.constant 0 : i32
    %c0_i32_0 = arith.constant 0 : i32
    %c0_i32_1 = arith.constant 0 : i32
    return %c0_i32, %c0_i32_0 : i32, i32
  }
  func.func @transform_8(%arg0: i32) -> (i32, i32) {
    %c0_i32 = arith.constant 0 : i32
    %c0_i32_0 = arith.constant 0 : i32
    %c0_i32_1 = arith.constant 0 : i32
    return %c0_i32, %c0_i32_0 : i32, i32
  }
  func.func @transform_9(%arg0: i32) -> (i32, i32) {
    %c0_i32 = arith.constant 0 : i32
    %c0_i32_0 = arith.constant 0 : i32
    %c0_i32_1 = arith.constant 0 : i32
    return %c0_i32, %c0_i32_0 : i32, i32
  }
  func.func @transform_10(%arg0: i32) -> (i32, i32) {
    %c0_i32 = arith.constant 0 : i32
    %c0_i32_0 = arith.constant 0 : i32
    %c0_i32_1 = arith.constant 0 : i32
    return %c0_i32, %c0_i32_0 : i32, i32
  }
  func.func @transform_11(%arg0: i32) -> (i32, i32) {
    %c0_i32 = arith.constant 0 : i32
    %c0_i32_0 = arith.constant 0 : i32
    %c0_i32_1 = arith.constant 0 : i32
    return %c0_i32, %c0_i32_0 : i32, i32
  }
  func.func @transform_12(%arg0: i32) -> (i32, i32) {
    %c0_i32 = arith.constant 0 : i32
    %c0_i32_0 = arith.constant 0 : i32
    %c0_i32_1 = arith.constant 0 : i32
    return %c0_i32, %c0_i32_0 : i32, i32
  }
  func.func @transform_13(%arg0: i32) -> (i32, i32) {
    %c0_i32 = arith.constant 0 : i32
    %c0_i32_0 = arith.constant 0 : i32
    %c0_i32_1 = arith.constant 0 : i32
    return %c0_i32, %c0_i32_0 : i32, i32
  }
  func.func @transform_14(%arg0: i32) -> (i32, i32) {
    %c0_i32 = arith.constant 0 : i32
    %c0_i32_0 = arith.constant 0 : i32
    %c0_i32_1 = arith.constant 0 : i32
    return %c0_i32, %c0_i32_0 : i32, i32
  }
  func.func @transform_15(%arg0: i32) -> (i32, i32, i32) {
    %c0_i32 = arith.constant 0 : i32
    %c0_i32_0 = arith.constant 0 : i32
    %c0_i32_1 = arith.constant 0 : i32
    return %arg0, %c0_i32, %c0_i32_0 : i32, i32, i32
  }
}

</mosaic_0001>

<bundles_post_ra>
// kernel: decoder_block_forward.1
= control target key start
LH: loop header
LB: loop body
LE: loop exit
PB: predicated region body
PF: predicated region fallthrough
CT: control target
= control target key end

     0   :  { %s1499_s18 = smov 0   ;;  %s1744_s0 = inlined_call_operand.vmem [shape: f32[2,4,256], index: 0, kind: input, shape index: {}]   ;;  %s1745_s1 = inlined_call_operand.vmem [shape: f32[2,4,64], index: 1, kind: input, shape index: {}]   ;;  %s1746_s2 = inlined_call_operand.vmem [shape: f32[64,256], index: 2, kind: input, shape index: {}]   ;;  %s1747_s3 = inlined_call_operand.vmem [shape: f32[5,256], index: 3, kind: input, shape index: {}]   ;;  %s1748_s4 = inlined_call_operand.vmem [shape: f32[8,8], index: 4, kind: input, shape index: {}]   ;;  %s1749_s5 = inlined_call_operand.vmem [shape: f32[8,1], index: 5, kind: input, shape index: {}]   ;;  %s1750_s6 = inlined_call_operand.vmem [shape: f32[8,5], index: 6, kind: input, shape index: {}]   ;;  %s1751_s7 = inlined_call_operand.vmem [shape: f32[8,5], index: 7, kind: input, shape index: {}]   ;;  %s1752_s8 = inlined_call_operand.vmem [shape: f32[8,1], index: 8, kind: input, shape index: {}]   ;;  %s1753_s9 = inlined_call_operand.vmem [shape: f32[16,8], index: 9, kind: input, shape index: {}]   ;;  %s1754_s10 = inlined_call_operand.vmem [shape: f32[16,1], index: 10, kind: input, shape index: {}]   ;;  %s1755_s11 = inlined_call_operand.vmem [shape: f32[16,1], index: 11, kind: input, shape index: {}]   ;;  %s1756_s12 = inlined_call_operand.vmem [shape: f32[16,1], index: 12, kind: input, shape index: {}]   ;;  %s1757_s13 = inlined_call_operand.vmem [shape: f32[16,16], index: 13, kind: input, shape index: {}]   ;;  %s1758_s14 = inlined_call_operand.vmem [shape: f32[16,1], index: 14, kind: input, shape index: {}]   ;;  %s1759_s15 = inlined_call_operand.vmem [shape: f32[2,16,256], index: 15, kind: output, shape index: {}]  }
   0x1 LB: > { %s1305_s19 = sadd.s32 4294967295, %s1399_s18   ;;  %p1309_p0 = scmp.ge.s32.totalorder %s1399_s18, 1  ;;  %s1399_s18 = sphi %s1499_s18, %s25_s18  }
   0x2   : > { %p446_p1 = scmp.lt.s32.totalorder %s1399_s18, 3 }
   0x4   : > { %p447_p2 = pnand %p1309_p0, %p446_p1 }
   0x5   : > { %p498_p3 = scmp.lt.s32.totalorder (!%p447_p2), %s1305_s19, 1  ;;  %s1401_s20 = smov (!%p447_p2), 124  }
   0x6   : > { %450 = sbr.rel (%p447_p2) target bundleno = 1365 (0x555), region = 80  ;;  %s1405_s16 = smov (!%p447_p2), 31  }
   0x7   : > { %s1410_s27 = smov (!%p447_p2), 34   ;;  %s1412_s28 = smov (!%p447_p2), 112  }
   0x8   : > { %s1413_s29 = smov (!%p447_p2), 80   ;;  %s1414_s30 = smov (!%p447_p2), 64  }
   0xb   : > { %v528_v0 = vld [vmem:[%s1746_s2 + $0x70] sm:$0xff]  ;;  %v529_v1 = vld [vmem:[%s1746_s2 + $0x78] sm:$0xff]  ;;  %v526_v2 = vld [vmem:[%s1746_s2 + $0x60] sm:$0xff]  ;;  %s1761_s19 = smov (!%p498_p3, %s1305_s19), 1  ;;  %vm530_vm0 = vcmask 523264   ;;  %v1402_v20 = vmov 0  }
   0xc   : > { %542 = vmatpush.msra.mxu0 %v528_v0  ;;  %562 = vmatpush.msra.mxu1 %v529_v1  ;;  %v527_v3 = vld [vmem:[%s1746_s2 + $0x68] sm:$0xff]  ;;  %v524_v4 = vld [vmem:[%s1746_s2 + $0x50] sm:$0xff]  ;;  %v525_v5 = vld [vmem:[%s1746_s2 + $0x58] sm:$0xff]  ;;  %s1337_s23 = sshll.u32 %s1761_s19, 3  ;;  %s1312_s21 = sshll.u32 %s1761_s19, 2  ;;  %v1403_v24 = vmov 1  }
   0xd   : > { %v522_v6 = vld [vmem:[%s1746_s2 + $0x40] sm:$0xff]  ;;  %v523_v7 = vld [vmem:[%s1746_s2 + $0x48] sm:$0xff]  ;;  %s502_s26 = scalar_lea.vmem %s1744_s0, %s1337_s23  ;;  %v520_v9 = vld [vmem:[%s1746_s2 + $0x30] sm:$0xff]  ;;  %s506_s17 = scalar_lea.vmem %s1745_s1, %s1312_s21  ;;  %1365 = vset.pattern.permute.xlu0 %v1402_v20  ;;  %1366 = vset.pattern.permute.xlu2 %v1403_v24  ;;  %v1404_v25 = vmov 2   ;;  %v1406_v28 = vmov 3   ;;  %vm581_vm1 = vcmask 1043456  }
   0xe   : > { %543 = vmatpush.msra.mxu0 %v526_v2  ;;  %563 = vmatpush.msra.mxu1 %v527_v3  ;;  %v1540_v8 = vld [vmem:[%s1748_s4] sm:$0xff]  ;;  %v521_v10 = vld [vmem:[%s1746_s2 + $0x38] sm:$0xff]  ;;  %v519_v13 = vld [vmem:[%s1746_s2 + $0x28] sm:$0xff]  ;;  %s1407_s23 = smov 33   ;;  %vm578_vm2 = vcmask 31744   ;;  %v1408_v36 = vmov 4  }
   0xf   : > { %v512_v11 = vld [vmem:[%s502_s26] sm:$0xff]  ;;  %576 = vrot.lane.b32.xlu0 %v1540_v8, %s1401_s20  ;;  %v516_v14 = vld [vmem:[%s1746_s2 + $0x10] sm:$0xff]  ;;  %v517_v15 = vld [vmem:[%s1746_s2 + $0x18] sm:$0xff]  ;;  %1368 = vset.pattern.permute.xlu1 %v1408_v36  ;;  %s1409_s21 = smov 30   ;;  %s1411_s26 = smov 32   ;;  %vm694_vm3 = vcmask 261120  }
  0x10   : > { %544 = vmatpush.msra.mxu0 %v524_v4  ;;  %564 = vmatpush.msra.mxu1 %v525_v5  ;;  %629 = vst [vmem:[#allocation1] ss:$2 sm:$0xff] %v512_v11  ;;  %v518_v12 = vld [vmem:[%s1746_s2 + $0x20] sm:$0xff]  ;;  %v515_v17 = vld [vmem:[%s1746_s2 + $0x8] sm:$0xff]  ;;  %vm835_vm4 = vcmask 269312   ;;  %vm899_vm5 = vcmask 277504  }
  0x11   : > { %v514_v16 = vld [vmem:[%s1746_s2] sm:$0xff]  ;;  %v1581_v21 = vld [vmem:[%s1747_s3 + $0x8] sm:$0x1f]  ;;  %vm744_vm6 = vcmask 252928   ;;  %vm793_vm7 = vcmask 916480   ;;  %vm884_vm8 = vcmask 654336  }
  0x12   : > { %545 = vmatpush.msra.mxu0 %v522_v6  ;;  %565 = vmatpush.msra.mxu1 %v523_v7  ;;  %v513_v18 = vld [vmem:[%s506_s17] sm:$0xf]  ;;  %v737_v23 = vperm.slane %v1581_v21, 1  ;;  %v892_v40 = vperm.slane %v1581_v21, 4  ;;  %v828_v50 = vperm.slane %v1581_v21, 3  ;;  %s1416_s17 = smov 125  }
  0x13   : > { %v678_v19 = vld [vmem:[%s1749_s5] sm:$0xff]  ;;  %vm713_vm9 = vcmask 244736   ;;  %vm775_vm10 = vcmask 1039360   ;;  %vm866_vm11 = vcmask 1022976   ;;  %vm930_vm12 = vcmask 1014784   ;;  %s1338_s22 = sshll.u32 %s1761_s19, 5 }
  0x14   : > { %546 = vmatpush.msra.mxu0 %v520_v9  ;;  %566 = vmatpush.msra.mxu1 %v521_v10  ;;  %v702_v22 = vld [vmem:[%s1751_s7] sm:$0xff]  ;;  %vm1013_vm13 = vcmask 801792   ;;  %vm1018_vm14 = vcmask 64512   ;;  %s511_s25 = scalar_lea.vmem %s1759_s15, %s1338_s22 }
  0x15   : > { %760 = vperm.xlu2 %1366, %v702_v22   ;;  %v1590_v26 = vld [vmem:[%s1747_s3] sm:$0x1f]  ;;  %915 = vperm.xlu1 %1368, %v702_v22  }
  0x16   : > { %547 = vmatpush.msra.mxu0 %v518_v12  ;;  %567 = vmatpush.msra.mxu1 %v519_v13  ;;  %v827_v27 = vperm.slane %v1590_v26, 3  ;;  %v736_v29 = vperm.slane %v1590_v26, 1  ;;  %v1598_v35 = vld [vmem:[%s1750_s6] sm:$0xff]  ;;  %v705_v37 = vperm.slane %v1590_v26, 0  ;;  %v891_v51 = vperm.slane %v1590_v26, 4 }
  0x17   : > { %681 = vperm.xlu0 %1365, %v678_v19   ;;  %v630_v33 = vld.sshfl [vmem:[#allocation1] sm:$0xff pattern:$0x75316420]  ;;  %v631_v34 = vld.sshfl [vmem:[#allocation1 + $0x8] sm:$0xff pattern:$0x75316420] }
  0x18   : > { %548 = vmatpush.msra.mxu0 %v516_v14  ;;  %568 = vmatpush.msra.mxu1 %v517_v15  ;;  %v706_v15 = vperm.slane %v1581_v21, 0 }
  0x1a   : > { %549 = vmatpush.msra.mxu0 %v514_v16  ;;  %569 = vmatpush.msra.mxu1 %v515_v17 }
  0x1b   : > { %1315 = vmatmul.msk.f32.vlgmr.msra.gmra.mxu0 %vm530_vm0, %v513_v18  ;;  %1316 = vmatmul.msk.f32.vlgmr.msra.gmra.mxu1 %vm530_vm0, %v513_v18 }
  0x1d   : > { %1367 = vset.pattern.permute.xlu2 %v1406_v28  ;;  %1369 = vset.pattern.permute.xlu1 %v1402_v20 }
  0x1e   : > { %851 = vperm.xlu2 %1367, %v702_v22   ;;  %731 = vperm.xlu1 %1369, %v702_v22  }
  0x1f   : > { %1372 = vset.pattern.permute.xlu0 %v1404_v25 }
  0x20   : > { %742 = vrot.lane.b32.xlu0 %v737_v23, %s1405_s16 }
  0x26   : > { %740 = vrot.lane.b32.xlu2 %v736_v29, %s1405_s16  ;;  %1373 = vset.pattern.permute.xlu1 %v1406_v28  ;;  %s1415_s16 = smov 127  }
  0x27   : > { %1370 = vset.pattern.permute.xlu2 %v1403_v24 }
  0x28   : > { %831 = vrot.lane.b32.xlu0 %v827_v27, %s1407_s23 }
  0x2e   : > { %753 = vperm.xlu2 %1370, %v1598_v35  }
  0x30   : > { %807 = vperm.xlu0 %1372, %v702_v22  }
  0x36   : > { %1371 = vset.pattern.permute.xlu2 %v1404_v25 }
  0x37   : > { %801 = vperm.xlu2 %1371, %v1598_v35  }
  0x38   : > { %1376 = vset.pattern.permute.xlu0 %v1402_v20 }
  0x39   : > { %709 = vrot.lane.b32.xlu0 %v705_v37, %s1409_s21 }
  0x3f   : > { %1374 = vset.pattern.permute.xlu2 %v1408_v36 }
  0x40   : > { %897 = vrot.lane.b32.xlu2 %v892_v40, %s1410_s27 }
  0x48   : > { %908 = vperm.xlu2 %1374, %v1598_v35  }
  0x50   : > { %1375 = vset.pattern.permute.xlu2 %v1402_v20 }
  0x6f   : > { %v761_v53 = vpop.permute.xlu2 %760 }
  0x78   : > { %v852_v55 = vpop.permute.xlu2 %851 }
  0x80   : > { %v741_v59 = vpop.permute.xlu2 %740 }
  0x81   : > { %v577_v30 = vpop.permute.xlu0 %576 }
  0x87   : > { %v916_v52 = vpop.permute.xlu1 %915 }
  0x88   : > { %v754_v3 = vpop.permute.xlu2 %753 }
  0x89   : > { %v682_v43 = vpop.permute.xlu0 %681 }
  0x90   : > { %v1622_v54 = vpop.permute.xlu1 %731 }
  0x92   : > { %v743_v9 = vpop.permute.xlu0 %742 }
  0x93   : > { %v745_v27 = vsel %vm744_vm6, %v741_v59, %v743_v9 }
  0x98   : > { %v551_v31 = vpop.f32.mrf.mxu0  ;;  %v571_v32 = vpop.f32.mrf.mxu1 }
  0x99   : > { %1317 = vmatpush.msk.msra.mxu2 %vm581_vm1, %v551_v31  ;;  %1319 = vmatpush.msk.msra.mxu3 %vm581_vm1, %v571_v32 }
  0x9a   : > { %1318 = vmatmul.msk.f32.vlgmr.msra.gmra.mxu2 %vm578_vm2, %v577_v30  ;;  %1320 = vmatmul.msk.f32.vlgmr.msra.gmra.mxu3 %vm578_vm2, %v577_v30  ;;  %v832_v17 = vpop.permute.xlu0 %831 }
  0x9b   : > { %1321 = vmatpush.msk.msrb.mxu2 %vm581_vm1, %v630_v33  ;;  %1323 = vmatpush.msk.msrb.mxu3 %vm581_vm1, %v631_v34 }
  0xa2   : > { %1322 = vmatmul.msk.f32.vlgmr.msrb.gmra.mxu2 %vm578_vm2, %v1540_v8  ;;  %1324 = vmatmul.msk.f32.vlgmr.msrb.gmra.mxu3 %vm578_vm2, %v1540_v8  ;;  %v802_v8 = vpop.permute.xlu2 %801 }
 0x11d   : > { %v605_v38 = vpop.f32.mrf.mxu2  ;;  %v625_v39 = vpop.f32.mrf.mxu3 }
 0x125   : > { %v655_v41 = vpop.f32.mrf.mxu2  ;;  %v675_v44 = vpop.f32.mrf.mxu3 }
 0x126   : > { %v656_v42 = vadd.f32 %v655_v41, %v605_v38  ;;  %v676_v47 = vadd.f32 %v675_v44, %v625_v39  ;;  %v808_v41 = vpop.permute.xlu0 %807 }
 0x128   : > { %v684_v45 = vadd.f32 %v682_v43, %v656_v42  ;;  %v685_v48 = vadd.f32 %v682_v43, %v676_v47 }
 0x12a   : > { %v1609_v46 = vmax.f32 %v684_v45, 0.0  ;;  %v1613_v49 = vmax.f32 %v685_v48, 0.0 }
 0x12c   : > { %690 = vrot.lane.b32.xlu1 %v1609_v46, %s1411_s26  ;;  %v804_v10 = vmul.f32 %v802_v8, %v1609_v46  ;;  %v805_v25 = vmul.f32 %v802_v8, %v1613_v49 }
 0x12e   : > { %v710_v42 = vpop.permute.xlu0 %709 }
 0x134   : > { %692 = vrot.lane.b32.xlu1 %v1613_v49, %s1411_s26 }
 0x13c   : > { %833 = vrot.lane.b32.xlu1 %v828_v50, %s1407_s23  ;;  %s1417_s23 = smov 98  }
 0x144   : > { %895 = vrot.lane.b32.xlu1 %v891_v51, %s1410_s27 }
 0x14c   : > { %844 = vperm.xlu1 %1373, %v1598_v35  }
 0x154   : > { %1382 = vset.pattern.permute.xlu1 %v1402_v20  ;;  %v898_v20 = vpop.permute.xlu2 %897 }
 0x15c   : > { %v909_v31 = vpop.permute.xlu2 %908 }
 0x19e   : > { %v691_v56 = vpop.permute.xlu1 %690 }
 0x19f   : > { %v1624_v57 = vsel %vm694_vm3, 0.0, %v691_v56 }
 0x1a0   : > { %v763_v58 = vmul.f32 %v761_v53, %v1624_v57  ;;  %v1629_v60 = vmul.f32 %v1622_v54, %v1624_v57  ;;  %v854_v4 = vmul.f32 %v852_v55, %v1624_v57  ;;  %v918_v5 = vmul.f32 %v916_v52, %v1624_v57 }
 0x1a1   : > { %v749_v14 = vmul.f32 %v741_v59, %v1624_v57  ;;  %v840_v30 = vmul.f32 %v832_v17, %v1624_v57  ;;  %v811_v59 = vmul.f32 %v808_v41, %v1613_v49 }
 0x1a2   : > { %787 = vrot.lane.b32.xlu0 %v763_v58, %s1412_s28 }
 0x1a3   : > { %v756_v16 = vmul.f32 %v754_v3, %v749_v14 }
 0x1a6   : > { %v693_v61 = vpop.permute.xlu1 %692 }
 0x1a7   : > { %v1631_v62 = vsel %vm694_vm3, %v691_v56, %v693_v61  ;;  %v1633_v63 = vsel %vm694_vm3, %v693_v61, 0.0  ;;  %v810_v56 = vmul.f32 %v808_v41, %v1609_v46 }
 0x1a8   : > { %v765_v0 = vmul.f32 %v761_v53, %v1633_v63  ;;  %v855_v1 = vmul.f32 %v852_v55, %v1631_v62  ;;  %v764_v2 = vmul.f32 %v761_v53, %v1631_v62  ;;  %v856_v7 = vmul.f32 %v852_v55, %v1633_v63 }
 0x1a9   : > { %v920_v11 = vmul.f32 %v916_v52, %v1633_v63  ;;  %v919_v12 = vmul.f32 %v916_v52, %v1631_v62  ;;  %v751_v19 = vmul.f32 %v743_v9, %v1633_v63  ;;  %v750_v29 = vmul.f32 %v745_v27, %v1631_v62 }
 0x1aa   : > { %791 = vrot.lane.b32.xlu2 %v765_v0, %s1412_s28  ;;  %880 = vrot.lane.b32.xlu0 %v855_v1, %s1413_s29  ;;  %v906_v39 = vmul.f32 %v898_v20, %v1633_v63  ;;  %v735_v52 = vmul.f32 %v1622_v54, %v1631_v62 }
 0x1ab   : > { %789 = vrot.lane.b32.xlu1 %v764_v2, %s1412_s28  ;;  %v758_v21 = vmul.f32 %v754_v3, %v751_v19  ;;  %v757_v34 = vmul.f32 %v754_v3, %v750_v29 }
 0x1ac   : > { %v913_v40 = vmul.f32 %v909_v31, %v906_v39 }
 0x1ae   : > { %v834_v6 = vpop.permute.xlu1 %833 }
 0x1af   : > { %v836_v18 = vsel %vm835_vm4, %v832_v17, %v834_v6  ;;  %v842_v36 = vmul.f32 %v834_v6, %v1633_v63 }
 0x1b0   : > { %v841_v23 = vmul.f32 %v836_v18, %v1631_v62 }
 0x1b2   : > { %878 = vrot.lane.b32.xlu2 %v854_v4, %s1413_s29  ;;  %942 = vrot.lane.b32.xlu0 %v918_v5, %s1414_s30 }
 0x1b3   : > { %882 = vrot.lane.b32.xlu1 %v856_v7, %s1413_s29 }
 0x1b6   : > { %v896_v13 = vpop.permute.xlu1 %895 }
 0x1b7   : > { %v900_v26 = vsel %vm899_vm5, %v896_v13, %v898_v20  ;;  %v718_v20 = vmul.f32 %v710_v42, %v1624_v57 }
 0x1b8   : > { %v905_v28 = vmul.f32 %v900_v26, %v1631_v62 }
 0x1ba   : > { %946 = vrot.lane.b32.xlu2 %v920_v11, %s1414_s30  ;;  %814 = vrot.lane.b32.xlu0 %v804_v10, %s1409_s21  ;;  %v912_v33 = vmul.f32 %v909_v31, %v905_v28 }
 0x1bb   : > { %944 = vrot.lane.b32.xlu1 %v919_v12, %s1414_s30 }
 0x1be   : > { %v845_v22 = vpop.permute.xlu1 %844 }
 0x1bf   : > { %v848_v24 = vmul.f32 %v845_v22, %v841_v23  ;;  %v847_v32 = vmul.f32 %v845_v22, %v840_v30  ;;  %v849_v38 = vmul.f32 %v845_v22, %v842_v36 }
 0x1c2   : > { %723 = vperm.xlu2 %1375, %v1598_v35   ;;  %769 = vrot.lane.b32.xlu0 %v756_v16, %s1415_s16  ;;  %v904_v35 = vmul.f32 %v896_v13, %v1624_v57 }
 0x1c3   : > { %711 = vrot.lane.b32.xlu1 %v706_v15, %s1409_s21 }
 0x1c4   : > { %v911_v37 = vmul.f32 %v909_v31, %v904_v35 }
 0x1ca   : > { %773 = vrot.lane.b32.xlu2 %v758_v21, %s1415_s16  ;;  %862 = vrot.lane.b32.xlu0 %v848_v24, %s1416_s17 }
 0x1cb   : > { %816 = vrot.lane.b32.xlu1 %v805_v25, %s1409_s21 }
 0x1d2   : > { %860 = vrot.lane.b32.xlu2 %v847_v32, %s1416_s17  ;;  %926 = vrot.lane.b32.xlu0 %v912_v33, %s1401_s20 }
 0x1d3   : > { %771 = vrot.lane.b32.xlu1 %v757_v34, %s1415_s16 }
 0x1da   : > { %924 = vrot.lane.b32.xlu2 %v911_v37, %s1401_s20 }
 0x1db   : > { %864 = vrot.lane.b32.xlu1 %v849_v38, %s1416_s17 }
 0x1e3   : > { %928 = vrot.lane.b32.xlu1 %v913_v40, %s1401_s20 }
 0x1eb   : > { %967 = vrot.lane.b32.xlu1 %v1609_v46, %s1409_s21  ;;  %v978_v46 = vld [vmem:[%s1752_s8] sm:$0xff] }
 0x204   : > { %v792_v43 = vpop.permute.xlu2 %791 }
 0x20c   : > { %v879_v47 = vpop.permute.xlu2 %878 }
 0x214   : > { %v788_v44 = vpop.permute.xlu0 %787  ;;  %v947_v2 = vpop.permute.xlu2 %946 }
 0x21c   : > { %v881_v50 = vpop.permute.xlu0 %880  ;;  %v724_v10 = vpop.permute.xlu2 %723 }
 0x21d   : > { %v790_v45 = vpop.permute.xlu1 %789  ;;  %v885_v3 = vsel %vm884_vm8, %v879_v47, %v881_v50 }
 0x21e   : > { %v794_v48 = vsel %vm793_vm7, %v788_v44, %v790_v45  ;;  %v795_v51 = vsel %vm793_vm7, %v790_v45, %v792_v43 }
 0x21f   : > { %v798_v53 = vadd.f32 %v794_v48, %v1629_v60  ;;  %v799_v58 = vadd.f32 %v795_v51, %v735_v52 }
 0x221   : > { %v825_v61 = vadd.f32 %v810_v56, %v798_v53  ;;  %v826_v1 = vadd.f32 %v811_v59, %v799_v58 }
 0x223   : > { %v889_v7 = vadd.f32 %v885_v3, %v825_v61 }
 0x224   : > { %v943_v4 = vpop.permute.xlu0 %942  ;;  %v774_v13 = vpop.permute.xlu2 %773 }
 0x225   : > { %v883_v55 = vpop.permute.xlu1 %882 }
 0x226   : > { %v886_v0 = vsel %vm884_vm8, %v881_v50, %v883_v55 }
 0x227   : > { %v890_v5 = vadd.f32 %v886_v0, %v826_v1 }
 0x22c   : > { %v815_v12 = vpop.permute.xlu0 %814  ;;  %v861_v16 = vpop.permute.xlu2 %860 }
 0x22d   : > { %v945_v6 = vpop.permute.xlu1 %944 }
 0x22e   : > { %v948_v54 = vsel %vm530_vm0, %v943_v4, %v945_v6  ;;  %v949_v60 = vsel %vm530_vm0, %v945_v6, %v947_v2  ;;  %vm1090_vm0 = vcmask 7168  }
 0x22f   : > { %v952_v8 = vadd.f32 %v948_v54, %v889_v7  ;;  %v953_v9 = vadd.f32 %v949_v60, %v890_v5  ;;  %v993_v54 = vld [vmem:[%s1754_s10 + $0x8] sm:$0xff]  ;;  %v992_v60 = vld [vmem:[%s1754_s10] sm:$0xff] }
 0x231   : > { %956 = vrot.lane.b32.xlu2 %v952_v8, %s1409_s21  ;;  %958 = vrot.lane.b32.xlu0 %v953_v9, %s1409_s21 }
 0x234   : > { %v770_v15 = vpop.permute.xlu0 %769  ;;  %v925_v22 = vpop.permute.xlu2 %924 }
 0x235   : > { %v712_v11 = vpop.permute.xlu1 %711 }
 0x236   : > { %v714_v19 = vsel %vm713_vm9, %v710_v42, %v712_v11  ;;  %v720_v25 = vmul.f32 %v712_v11, %v1633_v63  ;;  %v990_v11 = vld [vmem:[%s1753_s9] sm:$0xff] }
 0x237   : > { %v719_v21 = vmul.f32 %v714_v19, %v1631_v62 }
 0x238   : > { %v728_v28 = vmul.f32 %v724_v10, %v720_v25 }
 0x239   : > { %969 = vrot.lane.b32.xlu2 %v1613_v49, %s1409_s21  ;;  %981 = vperm.xlu0 %1376, %v978_v46   ;;  %v726_v49 = vmul.f32 %v724_v10, %v718_v20  ;;  %v727_v29 = vmul.f32 %v724_v10, %v719_v21 }
 0x23a   : > { %v783_v34 = vadd.f32 %v774_v13, %v728_v28 }
 0x23c   : > { %v863_v18 = vpop.permute.xlu0 %862 }
 0x23d   : > { %v817_v14 = vpop.permute.xlu1 %816  ;;  %v867_v36 = vsel %vm866_vm11, %v861_v16, %v863_v18 }
 0x23e   : > { %v818_v57 = vsel %vm713_vm9, %v815_v12, %v817_v14  ;;  %v824_v38 = vadd.f32 %v817_v14, %v783_v34  ;;  %v991_v14 = vld [vmem:[%s1753_s9 + $0x8] sm:$0xff] }
 0x244   : > { %v927_v30 = vpop.permute.xlu0 %926 }
 0x245   : > { %v772_v17 = vpop.permute.xlu1 %771  ;;  %v931_v42 = vsel %vm930_vm12, %v925_v22, %v927_v30 }
 0x246   : > { %v776_v24 = vsel %vm775_vm10, %v770_v15, %v772_v17  ;;  %v777_v27 = vsel %vm775_vm10, %v772_v17, %v774_v13 }
 0x247   : > { %v781_v26 = vadd.f32 %v776_v24, %v726_v49  ;;  %v782_v31 = vadd.f32 %v777_v27, %v727_v29 }
 0x249   : > { %v822_v32 = vadd.f32 %v815_v12, %v781_v26  ;;  %v823_v62 = vadd.f32 %v818_v57, %v782_v31  ;;  %v1418_v26 = vmov 256.0   ;;  %v1087_v57 = vld [vmem:[%s1755_s11 + $0x8] sm:$0xff] }
 0x24a   : > { %1383 = vrcp.f32 %v1418_v26 }
 0x24b   : > { %v872_v39 = vadd.f32 %v867_v36, %v822_v32 }
 0x24d   : > { %v865_v23 = vpop.permute.xlu1 %864  ;;  %v936_v44 = vadd.f32 %v931_v42, %v872_v39 }
 0x24e   : > { %v868_v37 = vsel %vm866_vm11, %v863_v18, %v865_v23  ;;  %v874_v41 = vadd.f32 %v865_v23, %v824_v38 }
 0x24f   : > { %v873_v40 = vadd.f32 %v868_v37, %v823_v62 }
 0x250   : > { %v1384_v27 = vpop.eup %1383 }
 0x251   : > { %v1078_v28 = vmul.f32 256.0, %v1384_v27  ;;  %vm1082_vm15 = vweird.f32 %v1384_v27 }
 0x253   : > { %v1079_v29 = vsub.f32 1.0, %v1078_v28 }
 0x255   : > { %v929_v35 = vpop.permute.xlu1 %928 }
 0x256   : > { %v932_v63 = vsel %vm930_vm12, %v927_v30, %v929_v35  ;;  %v938_v47 = vadd.f32 %v929_v35, %v874_v41  ;;  %v1080_v30 = vmul.f32 %v1384_v27, %v1079_v29  ;;  %v1086_v35 = vld [vmem:[%s1755_s11] sm:$0xff] }
 0x257   : > { %v937_v45 = vadd.f32 %v932_v63, %v873_v40 }
 0x258   : > { %v1081_v31 = vadd.f32 %v1384_v27, %v1080_v30 }
 0x25a   : > { %v1083_v32 = vsel %vm1082_vm15, %v1384_v27, %v1081_v31 }
 0x25d   : > { %v968_v55 = vpop.permute.xlu1 %967 }
 0x28b   : > { %v957_v33 = vpop.permute.xlu2 %956 }
 0x28c   : > { %v964_v50 = vadd.f32 %v957_v33, %v936_v44 }
 0x28e   : > { %v975_v58 = vadd.f32 %v968_v55, %v964_v50  ;;  %v1102_v50 = vld [vmem:[%s1756_s12 + $0x8] sm:$0xff] }
 0x293   : > { %v970_v51 = vpop.permute.xlu2 %969 }
 0x294   : > { %v971_v56 = vsel %vm713_vm9, %v968_v55, %v970_v51 }
 0x2a3   : > { %v959_v43 = vpop.permute.xlu0 %958 }
 0x2a4   : > { %v960_v48 = vsel %vm713_vm9, %v957_v33, %v959_v43  ;;  %v966_v53 = vadd.f32 %v959_v43, %v938_v47  ;;  %vm1177_vm9 = vcmask 130048  }
 0x2a5   : > { %v965_v52 = vadd.f32 %v960_v48, %v937_v45  ;;  %v1101_v48 = vld [vmem:[%s1756_s12] sm:$0xff] }
 0x2a6   : > { %v977_v61 = vadd.f32 %v970_v51, %v966_v53 }
 0x2a7   : > { %v976_v59 = vadd.f32 %v971_v56, %v965_v52 }
 0x2ab   : > { %v982_v0 = vpop.permute.xlu0 %981 }
 0x2ac   : > { %v984_v1 = vadd.f32 %v982_v0, %v975_v58  ;;  %v985_v2 = vadd.f32 %v982_v0, %v976_v59  ;;  %v986_v3 = vadd.f32 %v982_v0, %v977_v61 }
 0x2ae   : > { %v987_v4 = vmax.f32 %v984_v1, 0.0  ;;  %v988_v5 = vmax.f32 %v985_v2, 0.0  ;;  %v989_v6 = vmax.f32 %v986_v3, 0.0 }
 0x2b0   : > { %1011 = vrot.lane.b32.xlu2 %v989_v6, %s1417_s23  ;;  %v1377_v7 = vpack.i.bf16 %v988_v5, %v987_v4 }
 0x2b2   : > { %1378 = vrot.lane.b32.xlu1 %v1377_v7, %s1417_s23 }
 0x2b8   : > { %1001 = vperm.xlu2 %1375, %v993_v54  }
 0x2ba   : > { %996 = vperm.xlu1 %1382, %v992_v60  }
 0x30a   : > { %v1012_v10 = vpop.permute.xlu2 %1011 }
 0x312   : > { %v1002_v22 = vpop.permute.xlu2 %1001 }
 0x324   : > { %v1379_v8 = vpop.permute.xlu1 %1378 }
 0x325   : > { %v1381_v9 = vunpack.i.h.bf16 %v1379_v8  ;;  %v1380_v46 = vunpack.i.l.bf16 %v1379_v8 }
 0x327   : > { %v1014_v12 = vsel %vm1013_vm13, %v1380_v46, %v1381_v9  ;;  %v1015_v13 = vsel %vm1013_vm13, %v1381_v9, %v1012_v10 }
 0x328   : > { %1040 = vmatpush.msra.mxu2 %v1014_v12  ;;  %1063 = vmatpush.msra.mxu3 %v1015_v13 }
 0x329   : > { %1325 = vmatmul.msk.f32.vlgmr.msra.gmra.mxu2 %vm1018_vm14, %v990_v11  ;;  %1327 = vmatmul.msk.f32.vlgmr.msra.gmra.mxu3 %vm1018_vm14, %v990_v11 }
 0x32c   : > { %v997_v15 = vpop.permute.xlu1 %996 }
 0x331   : > { %1326 = vmatmul.msk.f32.gmra.mxu2 %vm1018_vm14, %v991_v14  ;;  %1328 = vmatmul.msk.f32.gmra.mxu3 %vm1018_vm14, %v991_v14 }
 0x3ac   : > { %v1042_v16 = vpop.f32.mrf.mxu2  ;;  %v1065_v17 = vpop.f32.mrf.mxu3 }
 0x3ad   : > { %v1697_v18 = vadd.f32 %v1042_v16, %v997_v15  ;;  %v1699_v19 = vadd.f32 %v1065_v17, %v997_v15 }
 0x3af   : > { %v1071_v20 = vadd.f32 %v1699_v19, %v1697_v18 }
 0x3b1   : > { %1072 = vadd.xlane.f32.xlu0 %v1071_v20  ;;  %v1165_v20 = vld [vmem:[%s1758_s14] sm:$0xff] }
 0x3b4   : > { %v1045_v23 = vpop.f32.mrf.mxu2  ;;  %v1068_v24 = vpop.f32.mrf.mxu3 }
 0x3b5   : > { %v1703_v49 = vadd.f32 %v1045_v23, %v1002_v22  ;;  %v1705_v21 = vadd.f32 %v1068_v24, %v1002_v22  ;;  %v1166_v22 = vld [vmem:[%s1758_s14 + $0x8] sm:$0xff] }
 0x3b7   : > { %v1074_v25 = vadd.f32 %v1705_v21, %v1703_v49 }
 0x3b9   : > { %1075 = vadd.xlane.f32.xlu1 %v1074_v25 }
 0x424   : > { %v1073_v33 = vpop.xlane.xlu0 %1072 }
 0x425   : > { %v1084_v34 = vmul.f32 %v1083_v32, %v1073_v33  ;;  %v1163_v33 = vld [vmem:[%s1757_s13] sm:$0xff] }
 0x427   : > { %v1088_v37 = vmul.f32 %v1086_v35, %v1084_v34 }
 0x429   : > { %v1091_v62 = vsel %vm1090_vm0, %v1088_v37, 0.0 }
 0x42c   : > { %v1076_v36 = vpop.xlane.xlu1 %1075 }
 0x42d   : > { %v1085_v38 = vmul.f32 %v1083_v32, %v1076_v36 }
 0x42f   : > { %v1089_v39 = vmul.f32 %v1087_v57, %v1085_v38 }
 0x431   : > { %v1092_v63 = vsel %vm1090_vm0, %v1089_v39, 0.0 }
 0x432   : > { %v1093_v40 = vadd.f32 %v1092_v63, %v1091_v62 }
 0x434   : > { %v1094_v41 = vrot.slane %v1093_v40, 4 }
 0x436   : > { %v1095_v42 = vadd.f32 %v1094_v41, %v1093_v40 }
 0x438   : > { %v1096_v43 = vrot.slane %v1095_v42, 2 }
 0x43a   : > { %v1097_v44 = vadd.f32 %v1096_v43, %v1095_v42 }
 0x43c   : > { %v1098_v45 = vrot.slane %v1097_v44, 1 }
 0x43e   : > { %v1099_v47 = vadd.f32 %v1098_v45, %v1097_v44 }
 0x440   : > { %v1100_v51 = vmax.f32 %v1099_v47, 0.0 }
 0x442   : > { %v1103_v52 = vmul.f32 %v1101_v48, %v1100_v51  ;;  %v1104_v53 = vmul.f32 %v1102_v50, %v1100_v51 }
 0x444   : > { %v1329_v55 = vmul.f32 -1.442695, %v1103_v52  ;;  %v1330_v56 = vmul.f32 -1.442695, %v1104_v53 }
 0x446   : > { %1385 = vpow2.f32 %v1329_v55 }
 0x447   : > { %1387 = vpow2.f32 %v1330_v56 }
 0x44c   : > { %v1386_v58 = vpop.eup %1385 }
 0x44d   : > { %v1388_v59 = vpop.eup %1387  ;;  %v1113_v61 = vadd.f32 1.0, %v1386_v58 }
 0x44e   : > { %v1114_v0 = vadd.f32 1.0, %v1388_v59 }
 0x44f   : > { %1389 = vrcp.f32 %v1113_v61  ;;  %v1126_v13 = vand.u32 2147483648, %v1113_v61  ;;  %vm1120_vm6 = vweird.f32 %v1113_v61  ;;  %v1124_v14 = vand.u32 2147483647, %v1113_v61 }
 0x450   : > { %1391 = vrcp.f32 %v1114_v0  ;;  %v1141_v7 = vand.u32 2147483648, %v1114_v0  ;;  %v1139_v60 = vand.u32 2147483647, %v1114_v0  ;;  %vm1135_vm2 = vweird.f32 %v1114_v0 }
 0x451   : > { %v1127_v16 = vor.u32 1.1754944e-38, %v1126_v13  ;;  %vm1125_vm8 = vcmp.eq.f32.partialorder %v1124_v14, 8.507059e+37 }
 0x452   : > { %v1142_v46 = vor.u32 1.1754944e-38, %v1141_v7  ;;  %vm1140_vm4 = vcmp.eq.f32.partialorder %v1139_v60, 8.507059e+37 }
 0x455   : > { %v1390_v1 = vpop.eup %1389 }
 0x456   : > { %v1392_v2 = vpop.eup %1391  ;;  %v1116_v3 = vmul.f32 %v1390_v1, %v1113_v61  ;;  %vm1121_vm5 = vweird.f32 %v1390_v1 }
 0x457   : > { %v1131_v4 = vmul.f32 %v1392_v2, %v1114_v0  ;;  %vm1136_vm1 = vweird.f32 %v1392_v2  ;;  %vm1122_vm7 = vmor %vm1120_vm6, %vm1121_vm5 }
 0x458   : > { %v1117_v6 = vsub.f32 1.0, %v1116_v3  ;;  %vm1137_vm3 = vmor %vm1135_vm2, %vm1136_vm1 }
 0x459   : > { %v1132_v5 = vsub.f32 1.0, %v1131_v4 }
 0x45a   : > { %v1118_v9 = vmul.f32 %v1390_v1, %v1117_v6 }
 0x45b   : > { %v1133_v54 = vmul.f32 %v1392_v2, %v1132_v5 }
 0x45c   : > { %v1119_v12 = vadd.f32 %v1390_v1, %v1118_v9 }
 0x45d   : > { %v1134_v8 = vadd.f32 %v1392_v2, %v1133_v54 }
 0x45e   : > { %v1123_v15 = vsel %vm1122_vm7, %v1390_v1, %v1119_v12 }
 0x45f   : > { %v1138_v10 = vsel %vm1137_vm3, %v1392_v2, %v1134_v8  ;;  %v1128_v17 = vsel %vm1125_vm8, %v1127_v16, %v1123_v15 }
 0x460   : > { %v1143_v11 = vsel %vm1140_vm4, %v1142_v46, %v1138_v10 }
 0x461   : > { %1152 = vperm.xlu2 %1375, %v1143_v11  }
 0x469   : > { %1147 = vperm.xlu2 %1375, %v1128_v17  }
 0x471   : > { %1169 = vperm.xlu2 %1375, %v1165_v20  }
 0x479   : > { %1174 = vperm.xlu2 %1375, %v1166_v22  }
 0x4bb   : > { %v1153_v23 = vpop.permute.xlu2 %1152 }
 0x4bc   : > { %v1157_v24 = vmul.f32 %v1153_v23, %v1703_v49  ;;  %v1158_v25 = vmul.f32 %v1153_v23, %v1705_v21  ;;  %v1164_v49 = vld [vmem:[%s1757_s13 + $0x8] sm:$0xff] }
 0x4be   : > { %v1161_v26 = vmax.f32 %v1157_v24, 0.0  ;;  %v1162_v27 = vmax.f32 %v1158_v25, 0.0 }
 0x4c0   : > { %1198 = vmatpush.msrb.mxu0 %v1161_v26  ;;  %1221 = vmatpush.msrb.mxu1 %v1162_v27 }
 0x4c3   : > { %v1148_v28 = vpop.permute.xlu2 %1147 }
 0x4c4   : > { %v1155_v29 = vmul.f32 %v1148_v28, %v1697_v18  ;;  %v1156_v30 = vmul.f32 %v1148_v28, %v1699_v19 }
 0x4c6   : > { %v1159_v31 = vmax.f32 %v1155_v29, 0.0  ;;  %v1160_v32 = vmax.f32 %v1156_v30, 0.0 }
 0x4c8   : > { %1199 = vmatpush.msrb.mxu0 %v1159_v31  ;;  %1222 = vmatpush.msrb.mxu1 %v1160_v32 }
 0x4c9   : > { %1331 = vmatmul.msk.f32.vlgmr.msrb.gmra.mxu0 %vm1177_vm9, %v1163_v33  ;;  %1333 = vmatmul.msk.f32.vlgmr.msrb.gmra.mxu1 %vm1177_vm9, %v1163_v33 }
 0x4cb   : > { %v1170_v18 = vpop.permute.xlu2 %1169 }
 0x4d1   : > { %1332 = vmatmul.msk.f32.gmra.mxu0 %vm1177_vm9, %v1164_v49  ;;  %1334 = vmatmul.msk.f32.gmra.mxu1 %vm1177_vm9, %v1164_v49 }
 0x4d3   : > { %v1175_v37 = vpop.permute.xlu2 %1174 }
 0x546   : > { %v1201_v19 = vpop.f32.mrf.mxu0  ;;  %v1224_v21 = vpop.f32.mrf.mxu1 }
 0x547   : > { %v1202_v34 = vadd.f32 %v1201_v19, %v1170_v18  ;;  %v1225_v35 = vadd.f32 %v1224_v21, %v1170_v18 }
 0x549   : > { %v1230_v57 = vmax.f32 %v1202_v34, 0.0  ;;  %v1231_v36 = vmax.f32 %v1225_v35, 0.0 }
 0x54b   : > { %1234 = vst [vmem:[%s511_s25] sm:$0xff] %v1230_v57 }
 0x54c   : > { %1235 = vst [vmem:[%s511_s25 + $0x8] sm:$0xff] %v1231_v36 }
 0x54e   : > { %v1204_v38 = vpop.f32.mrf.mxu0  ;;  %v1227_v39 = vpop.f32.mrf.mxu1 }
 0x54f   : > { %v1205_v62 = vadd.f32 %v1204_v38, %v1175_v37  ;;  %v1228_v63 = vadd.f32 %v1227_v39, %v1175_v37 }
 0x551   : > { %v1232_v40 = vmax.f32 %v1205_v62, 0.0  ;;  %v1233_v41 = vmax.f32 %v1228_v63, 0.0 }
 0x553   : > { %1236 = vst [vmem:[%s511_s25 + $0x10] sm:$0xff] %v1232_v40 }
 0x554   : > { %1237 = vst [vmem:[%s511_s25 + $0x18] sm:$0xff] %v1233_v41 }
 0x555 PF: > { %s25_s18 = sadd.s32 1, %s1399_s18  }
 0x556   : > { %p22_p4 = scmp.ge.s32.totalorder %s25_s18, 4  }
 0x558   :  { %24 = sbr.rel (!%p22_p4) target bundleno = 1 (0x1), region = 113 }

</bundles_post_ra>
